<compile_context>
chip_gen: v7x
topology: tpu7x:2x2x1
jax: 0.10.0
libtpu: 0.0.40
codegen_flags: <defaults>
</compile_context>

<pallas_src>
import math
import re

import jax
import jax.numpy as jnp
from jax.experimental import pallas as pl
from jax.experimental.pallas import tpu as pltpu


def _affine_kernel(x_ref, p_ref, o_ref):
    # Pure VPU elementwise FMA; p_ref is (2, W): row 0 = scale, row 1 = shift.
    # The (1, W) operands broadcast over the row tile; dtype promotion happens
    # in vregs and only the store casts to the output dtype.
    res = x_ref[...] * p_ref[0:1, :] + p_ref[1:2, :]
    o_ref[...] = res.astype(o_ref.dtype)


def _tpu_generation():
    """Best-effort TPU generation from device_kind; defaults to 6."""
    try:
        kind = jax.devices()[0].device_kind
    except Exception:
        return 6
    m = re.search(r"(\d+)", str(kind))
    return int(m.group(1)) if m else 6


def _default_block_bytes():
    gen = _tpu_generation()
    if gen >= 7:
        # v7x: ~3.2 TB/s HBM, 64 MiB physical VMEM -> bigger blocks amortize
        # the per-grid-step overhead.
        return 4 * 1024 * 1024
    # v5e / v6e: 2 MiB is already on the measured 85-86% roofline plateau and
    # stays well under the 16 MiB (v5e) default scoped VMEM limit.
    return 2 * 1024 * 1024


def affine_forward(x, scale, shift, *, target_block_bytes=None,
                   min_kernel_bytes=64 * 1024, min_grid_steps=4,
                   donate_input=False, force_kernel=False):
    """Computes x * scale + shift with a Pallas TPU kernel.

    x:     (..., H) array
    scale: scalar, (H,) or (1, H)  (per-feature affine over the last dim)
    shift: scalar, (H,) or (1, H)
    """
    orig_shape = x.shape
    H = orig_shape[-1]
    x_dtype = x.dtype

    scale_arr = jnp.asarray(scale)
    shift_arr = jnp.asarray(shift)
    param_dtype = jnp.result_type(scale_arr, shift_arr)
    out_dtype = jnp.result_type(x, scale_arr, shift_arr)

    scale_v = jnp.broadcast_to(scale_arr.astype(param_dtype).reshape(-1), (H,))
    shift_v = jnp.broadcast_to(shift_arr.astype(param_dtype).reshape(-1), (H,))

    x_itemsize = jnp.dtype(x_dtype).itemsize
    out_itemsize = jnp.dtype(out_dtype).itemsize

    if target_block_bytes is None:
        target_block_bytes = _default_block_bytes()

    # Tiny-problem bypass: pallas_call launch / DMA setup cost dominates below
    # this size; a fused XLA elementwise op is strictly faster.
    if not force_kernel and x.size * max(x_itemsize, out_itemsize) < min_kernel_bytes:
        return (x * scale_v + shift_v).astype(out_dtype)

    x2d = x.reshape(-1, H)
    R = x2d.shape[0]

    # ---- Guaranteed lane-dense folding: last dim is a multiple of 128 -------
    pad_rows = 0
    if H % 128 != 0:
        W = (H * 128) // math.gcd(H, 128)       # lcm(H, 128)
        fold = W // H
        R_pad = pl.cdiv(R, fold) * fold
        pad_rows = R_pad - R
        if pad_rows:                            # pad a handful of rows, slice later
            x2d = jnp.pad(x2d, ((0, pad_rows), (0, 0)))
        x2d = x2d.reshape(R_pad // fold, W)
        scale_row = jnp.tile(scale_v, fold)
        shift_row = jnp.tile(shift_v, fold)
    else:
        W = H
        fold = 1
        scale_row = scale_v
        shift_row = shift_v

    params = jnp.stack([scale_row, shift_row])  # (2, W), stays resident in VMEM
    Rf = x2d.shape[0]

    # ---- Row tile sized against VMEM + per-step overhead ---------------------
    # sublane quantum per dtype: 8 (f32), 16 (bf16), 32 (int8/fp8); honor both
    # the input and output dtypes.
    sublane = max(8, 32 // x_itemsize, 32 // out_itemsize)
    rows_budget = max(sublane, target_block_bytes // max(1, W * x_itemsize))
    row_tile = max(sublane, (rows_budget // sublane) * sublane)
    # Keep >= min_grid_steps blocks for mid-size inputs so prefetch of block
    # i+1 overlaps compute on i and writeback of i-1 (grid=(1,) can't pipeline).
    if Rf > min_grid_steps * sublane:
        cap = max(sublane, ((Rf // min_grid_steps) // sublane) * sublane)
        row_tile = min(row_tile, cap)
    if row_tile >= Rf:
        row_tile = Rf                           # genuinely tiny: single full block
    grid = (pl.cdiv(Rf, row_tile),)             # partial last block masked by Pallas

    # Double-buffered input + output blocks plus the resident params operand.
    vmem_need = (2 * row_tile * W * (x_itemsize + out_itemsize)
                 + 2 * W * jnp.dtype(param_dtype).itemsize)
    vmem_limit = None
    if vmem_need > 12 * 1024 * 1024:            # nearing the v5e 16 MiB default
        vmem_limit = min(2 * vmem_need, 64 * 1024 * 1024)

    io_aliases = {}
    if donate_input and x_dtype == out_dtype:
        io_aliases = {0: 0}                     # output reuses x2d's buffer

    out2d = pl.pallas_call(
        _affine_kernel,
        out_shape=jax.ShapeDtypeStruct((Rf, W), out_dtype),
        grid=grid,
        in_specs=[
            pl.BlockSpec((row_tile, W), lambda i: (i, 0)),
            pl.BlockSpec((2, W), lambda i: (0, 0)),   # constant idx -> resident
        ],
        out_specs=pl.BlockSpec((row_tile, W), lambda i: (i, 0)),
        input_output_aliases=io_aliases,
        compiler_params=pltpu.CompilerParams(
            # TODO(synk): on v7x, evaluate dimension_semantics=(pltpu.CORE_PARALLEL,)
            # to shard the row axis across both TensorCores; "parallel" is the
            # safe choice on every generation.
            dimension_semantics=("parallel",),
            vmem_limit_bytes=vmem_limit,
        ),
    )(x2d, params)

    if fold > 1:
        out2d = out2d.reshape(Rf * fold, H)
        if pad_rows:
            out2d = out2d[:R]
    return out2d.reshape(orig_shape)


if __name__ == "__main__":
    key = jax.random.PRNGKey(0)
    k1, k2, k3, k4, k5, k6 = jax.random.split(key, 6)

    # 1) Module-scale shapes: inputs (batch=2, seq=8, hidden=32), per-feature
    #    scale/shift of shape (32,).  H=32 folds to a 128-lane last dim.
    batch, seq, hidden = 2, 8, 32
    x = jax.random.normal(k1, (batch, seq, hidden), dtype=jnp.float32)
    scale = jax.random.normal(k2, (hidden,), dtype=jnp.float32)
    shift = jax.random.normal(k3, (hidden,), dtype=jnp.float32)
    out = jax.block_until_ready(affine_forward(x, scale, shift, force_kernel=True))
    ref = x * scale + shift
    assert out.shape == x.shape and out.dtype == ref.dtype
    assert jnp.allclose(out, ref, atol=1e-6, rtol=1e-6)

    # 2) H=96 (folds to W=384), rows divisible by the fold; a deliberately small
    #    block so the cdiv grid produces multiple steps and a partial last block.
    b2, s2, h2 = 3, 40, 96
    x2 = jax.random.normal(k4, (b2, s2, h2), dtype=jnp.float32)
    scale2 = jnp.linspace(0.5, 1.5, h2, dtype=jnp.float32)
    shift2 = jnp.linspace(-1.0, 1.0, h2, dtype=jnp.float32)
    out2 = jax.block_until_ready(affine_forward(
        x2, scale2, shift2, force_kernel=True, target_block_bytes=8 * 1024))
    ref2 = x2 * scale2 + shift2
    assert out2.shape == x2.shape
    assert jnp.allclose(out2, ref2, atol=1e-6, rtol=1e-6)

    # 3) Padding path: H=32 with a row count NOT divisible by the fold factor
    #    (R=65, fold=4 -> 3 pad rows), scalar scale, multi-step grid.
    x3 = jax.random.normal(k5, (5, 13, 32), dtype=jnp.float32)
    scale3 = jnp.float32(1.7)
    shift3 = jax.random.normal(k6, (32,), dtype=jnp.float32)
    out3 = jax.block_until_ready(affine_forward(
        x3, scale3, shift3, force_kernel=True, target_block_bytes=4 * 1024))
    ref3 = x3 * scale3 + shift3
    assert out3.shape == x3.shape
    assert jnp.allclose(out3, ref3, atol=1e-6, rtol=1e-6)

    # 4) Lane-aligned H (no fold) with enough rows to trigger the min-grid-step
    #    cap: pipelined multi-block path at the generation-default block size.
    x4 = jax.random.normal(k1, (64, 512), dtype=jnp.float32)
    scale4 = jax.random.normal(k2, (512,), dtype=jnp.float32)
    shift4 = jax.random.normal(k3, (512,), dtype=jnp.float32)
    out4 = jax.block_until_ready(affine_forward(x4, scale4, shift4, force_kernel=True))
    ref4 = x4 * scale4 + shift4
    assert out4.shape == x4.shape
    assert jnp.allclose(out4, ref4, atol=1e-6, rtol=1e-6)

    print("KERNEL_OK")
</pallas_src>

<mosaic_0001>
module attributes {stable_mosaic.version = 11 : i64} {
  func.func @_affine_kernel(%arg0: i32, %arg1: memref<4x128xf32, #tpu.memory_space<vmem>>, %arg2: memref<2x128xf32, #tpu.memory_space<vmem>>, %arg3: memref<4x128xf32, #tpu.memory_space<vmem>>) attributes {dimension_semantics = [#tpu.dimension_semantics<parallel>], iteration_bounds = array<i64: 1>, scalar_prefetch = 0 : i64, scratch_operands = 0 : i64, tpu.core_type = #tpu.core_type<tc>, window_params = [{transform_indices = @transform_0, window_bounds = array<i64: 4, 128>}, {pipeline_mode = #tpu.pipeline_mode<synchronous>, transform_indices = @transform_1, window_bounds = array<i64: 2, 128>}, {transform_indices = @transform_2, window_bounds = array<i64: 4, 128>}]} {
    %c0 = arith.constant 0 : index
    %c0_0 = arith.constant 0 : index
    %0 = vector.load %arg1[%c0, %c0_0] : memref<4x128xf32, #tpu.memory_space<vmem>>, vector<4x128xf32>
    %c0_1 = arith.constant 0 : index
    %c0_2 = arith.constant 0 : index
    %1 = vector.load %arg2[%c0_1, %c0_2] : memref<2x128xf32, #tpu.memory_space<vmem>>, vector<1x128xf32>
    %2 = vector.broadcast %1 : vector<1x128xf32> to vector<4x128xf32>
    %3 = arith.mulf %0, %2 : vector<4x128xf32>
    %c1 = arith.constant 1 : index
    %c0_3 = arith.constant 0 : index
    %4 = vector.load %arg2[%c1, %c0_3] : memref<2x128xf32, #tpu.memory_space<vmem>>, vector<1x128xf32>
    %5 = vector.broadcast %4 : vector<1x128xf32> to vector<4x128xf32>
    %6 = arith.addf %3, %5 : vector<4x128xf32>
    %c0_4 = arith.constant 0 : index
    %c0_5 = arith.constant 0 : index
    %7 = vector.load %arg3[%c0_4, %c0_5] : memref<4x128xf32, #tpu.memory_space<vmem>>, vector<4x128xf32>
    tpu.vector_store %arg3[%c0_4, %c0_5], %6 {strides = array<i32>} : memref<4x128xf32, #tpu.memory_space<vmem>>, vector<4x128xf32>,
    return
  }
  func.func @transform_0(%arg0: i32) -> (i32, i32) {
    %c0_i32 = arith.constant 0 : i32
    %c0_i32_0 = arith.constant 0 : i32
    return %arg0, %c0_i32 : i32, i32
  }
  func.func @transform_1(%arg0: i32) -> (i32, i32) {
    %c0_i32 = arith.constant 0 : i32
    %c0_i32_0 = arith.constant 0 : i32
    %c0_i32_1 = arith.constant 0 : i32
    return %c0_i32, %c0_i32_0 : i32, i32
  }
  func.func @transform_2(%arg0: i32) -> (i32, i32) {
    %c0_i32 = arith.constant 0 : i32
    %c0_i32_0 = arith.constant 0 : i32
    return %arg0, %c0_i32 : i32, i32
  }
}

</mosaic_0001>

<bundles_post_ra>
// kernel: tpu_custom_call.1
= control target key start
LH: loop header
LB: loop body
LE: loop exit
PB: predicated region body
PF: predicated region fallthrough
CT: control target
= control target key end

     0   :  { %7 = vsyncpa [#allocation3], 0  ;;  %s152_s0 = inlined_call_operand.hbm [shape: f32[4,128], index: 0, kind: input, shape index: {}]   ;;  %s153_s1 = inlined_call_operand.vmem [shape: f32[2,128], index: 1, kind: input, shape index: {}]   ;;  %s154_s2 = inlined_call_operand.hbm [shape: f32[4,128], index: 2, kind: output, shape index: {}]  }
   0x1   :  { %8 = vsyncpa [#allocation4], 0  ;;  %s105_s9 = smov [#allocation2]   ;;  %s57_s13 = scalar_lea.hbm %s152_s0, 64 }
   0x2   :  { %s15_s10 = sshll.u32 %s105_s9, 4  ;;  %p58_p0 = scmp.ne.s32.totalorder %s152_s0, %s57_s13  ;;  %s16_s10 = int_to_ptr.vmem [resolvable:$true] %s15_s10 }
   0x3   :  { %p61_p1 = scmp.lt.u32.totalorder %s57_s13, %s152_s0 }
   0x5   :  { %p63_p2 = pnand %p61_p1, %p58_p0 }
   0x7   :  { %66 = shalt.err (!%p63_p2)
}
   0x8   :  { %s67_s18 = scalar_lea.vmem %s16_s10, 64  ;;  %p72_p4 = scmp.lt.s32.totalorder %s16_s10, %s16_s10 }
   0x9   :  { %p68_p3 = scmp.ne.s32.totalorder %s16_s10, %s67_s18  ;;  %p73_p5 = scmp.lt.s32.totalorder %s67_s18, %s67_s18 }
   0xb   :  { %p74_p6 = por %p73_p5, %p72_p4 }
   0xd   :  { %p75_p7 = pnand %p74_p6, %p68_p3 }
   0xf   :  { %78 = shalt.err (!%p75_p7)
}
  0x10   :  { %18 = dma.hbm_to_vmem [thread:$0]  %s152_s0, 64, %s16_s10, [#allocation3]  }
  0x11   :  { %101 = dma.done.wait [#allocation3], 64  }
  0x12   :  { %102 = vsyncadd [#allocation3], 4294967232  ;;  %s106_s21 = smov [#allocation5]   ;;  %v24_v0 = vld [vmem:[#allocation2] sm:$0xf] }
  0x13   :  { %s44_s22 = sshll.u32 %s106_s21, 4  ;;  %v53_v1 = vld [vmem:[%s153_s1] ss:$0 sm:$0xff]  ;;  %v54_v2 = vld [vmem:[%s153_s1 + $0x1] ss:$0 sm:$0xff]  ;;  %s45_s22 = int_to_ptr.vmem [resolvable:$true] %s44_s22 }
  0x14   :  { %v30_v3 = vmul.f32 %v53_v1, %v24_v0  ;;  %s79_s27 = scalar_lea.vmem %s45_s22, 64  ;;  %p84_p9 = scmp.lt.s32.totalorder %s45_s22, %s45_s22 }
  0x15   :  { %p80_p8 = scmp.ne.s32.totalorder %s45_s22, %s79_s27  ;;  %p85_p10 = scmp.lt.s32.totalorder %s79_s27, %s79_s27 }
  0x16   :  { %v36_v4 = vadd.f32 %v54_v2, %v30_v3 }
  0x17   :  { %p86_p11 = por %p85_p10, %p84_p9 }
  0x18   :  { %37 = vst [vmem:[#allocation5] sm:$0xf] %v36_v4 }
  0x19   :  { %p87_p12 = pnand %p86_p11, %p80_p8 }
  0x1b   :  { %90 = shalt.err (!%p87_p12)
}
  0x1c   :  { %s91_s29 = scalar_lea.hbm %s154_s2, 64 }
  0x1d   :  { %p92_p13 = scmp.ne.s32.totalorder %s154_s2, %s91_s29  ;;  %p95_p0 = scmp.lt.u32.totalorder %s91_s29, %s154_s2 }
  0x1f   :  { %p97_p1 = pnand %p95_p0, %p92_p13 }
  0x21   :  { %100 = shalt.err (!%p97_p1)
}
  0x22   :  { %47 = dma.vmem_to_hbm [thread:$0]  %s45_s22, 64, %s154_s2, [#allocation4]  }
  0x23   :  { %103 = dma.done.wait [#allocation4], 64  }
  0x24   :  { %104 = vsyncadd [#allocation4], 4294967232 }
  0x25   :  { %51 = vsyncpa [#allocation3], 1 }
  0x26   :  { %52 = vsyncpa [#allocation4], 1 }

</bundles_post_ra>
